<compile_context>
chip_gen: v5e
topology: v5e:2x2
jax: 0.10.0
libtpu: 0.0.40
codegen_flags: <defaults>
</compile_context>

<pallas_src>
import functools

import jax
import jax.numpy as jnp
from jax import lax
from jax.experimental import pallas as pl
from jax.experimental.pallas import tpu as pltpu


def _mha_kernel(x_ref, w_ref, b_ref, fc_w_ref, fc_b_ref,
                o_ref, acc_ref, *, head_dim):
    h = pl.program_id(1)

    @pl.when(h == 0)
    def _():
        acc_ref[...] = jnp.zeros_like(acc_ref)

    x = x_ref[0]                         # (N, E), model dtype
    w = w_ref[0]                         # (E, 3D)  columns = [q | k | v]
    b = b_ref[0]                         # (1, 3D)

    # Fused per-head q/k/v projection: one MXU matmul, f32 accumulation.
    # The 1/sqrt(D) scale is already folded into the q columns of w/b.
    qkv = jnp.dot(x, w, preferred_element_type=jnp.float32) + b   # (N, 3D)

    D = head_dim
    q = qkv[:, :D]                       # (N, D) f32, pre-scaled
    k = qkv[:, D:2 * D]                  # (N, D) f32
    v = qkv[:, 2 * D:]                   # (N, D) f32

    # scores = q @ k^T, contracting the D axes directly (no explicit K
    # transpose through the XLU).  MXU inputs in the model dtype.
    scores = lax.dot_general(
        q.astype(x.dtype), k.astype(x.dtype),
        dimension_numbers=(((1,), (1,)), ((), ())),
        preferred_element_type=jnp.float32)                       # (N, N) f32

    # Numerically stable softmax in f32; defer the normalization.
    m = jnp.max(scores, axis=-1, keepdims=True)
    p = jnp.exp(scores - m)
    denom = jnp.sum(p, axis=-1, keepdims=True)
    # TODO(synk): Dropout(p=0.1) on the attention probabilities is identity
    # here (inference / eval() semantics).

    ctx = jnp.dot(p.astype(x.dtype), v.astype(x.dtype),
                  preferred_element_type=jnp.float32)              # (N, D)
    # Normalize after the PV matmul with the EUP reciprocal (O(N*D) muls,
    # no per-element divide on the VPU).
    ctx = ctx * pl.reciprocal(denom, approx=True)

    # This head's slab of fc_out: (N, D) @ (D, E), accumulated over heads.
    fc_w_h = fc_w_ref[0]                                           # (D, E)
    acc_ref[...] += jnp.dot(ctx.astype(fc_w_h.dtype), fc_w_h,
                            preferred_element_type=jnp.float32)

    @pl.when(h == pl.num_programs(1) - 1)
    def _():
        o_ref[0] = (acc_ref[...] + fc_b_ref[...]).astype(o_ref.dtype)


def multi_head_attention(x, qkv_w, qkv_b, fc_w, fc_b, num_heads):
    B, N, E = x.shape
    H = num_heads
    D = E // H
    assert H * D == E, "Embedding size must be divisible by number of heads"
    scale = 1.0 / (D ** 0.5)

    # ---- One-time weight re-layouts (weights only; no activation movement).
    # qkv_w: (E, 3E) in (in, out) layout; output columns follow PyTorch's
    # reshape(..., 3, H, D) ordering.
    w4 = qkv_w.reshape(E, 3, H, D)
    w4 = w4.at[:, 0].multiply(scale)            # fold scale into Q weights
    b3 = qkv_b.reshape(3, H, D)
    b3 = b3.at[0].multiply(scale)               # fold scale into Q bias
    # Per-head fused slab: (H, E, 3D), columns [q | k | v].
    w_heads = w4.transpose(2, 0, 1, 3).reshape(H, E, 3 * D)
    b_heads = b3.transpose(1, 0, 2).reshape(H, 1, 3 * D)
    fc_w_heads = fc_w.reshape(H, D, E)          # fc_out K-slab per head
    fc_b_2d = fc_b.reshape(1, E)

    # Scoped-VMEM budget derived from the block sizes (inputs double-buffered)
    # with generous headroom, capped at v7x physical VMEM.
    itemsize = jnp.dtype(x.dtype).itemsize
    blk_bytes = (N * E * itemsize              # x block
                 + E * 3 * D * itemsize        # fused qkv weight slab
                 + 3 * D * itemsize            # fused qkv bias slab
                 + D * E * itemsize            # fc_out row slab
                 + E * itemsize                # fc_out bias
                 + N * E * itemsize)           # output block
    work_bytes = 4 * (2 * N * N + 4 * N * D + 2 * N * E)   # f32 temporaries
    vmem_limit = min(int(4 * blk_bytes + 2 * work_bytes) + (4 << 20), 64 << 20)

    flops = 2 * B * H * (N * E * 3 * D + 2 * N * N * D + N * D * E)
    transcendentals = B * H * N * N
    bytes_accessed = (2 * B * N * E * itemsize
                      + B * H * (E * 3 * D + 3 * D + D * E) * itemsize
                      + E * itemsize)

    return pl.pallas_call(
        functools.partial(_mha_kernel, head_dim=D),
        out_shape=jax.ShapeDtypeStruct((B, N, E), x.dtype),
        grid_spec=pltpu.PrefetchScalarGridSpec(
            num_scalar_prefetch=0,
            grid=(B, H),
            in_specs=[
                # x block index is constant across the inner head axis, so the
                # pipeline re-uses it instead of re-fetching from HBM.
                pl.BlockSpec((1, N, E), lambda b, h: (b, 0, 0)),        # x
                pl.BlockSpec((1, E, 3 * D), lambda b, h: (h, 0, 0)),    # fused Wqkv slab
                pl.BlockSpec((1, 1, 3 * D), lambda b, h: (h, 0, 0)),    # fused bias slab
                pl.BlockSpec((1, D, E), lambda b, h: (h, 0, 0)),        # fc_w row slab
                pl.BlockSpec((1, E), lambda b, h: (0, 0)),              # fc_b
            ],
            out_specs=pl.BlockSpec((1, N, E), lambda b, h: (b, 0, 0)),
            scratch_shapes=[pltpu.VMEM((N, E), jnp.float32)],           # fc_out acc
        ),
        compiler_params=pltpu.CompilerParams(
            dimension_semantics=("parallel", "arbitrary"),
            vmem_limit_bytes=vmem_limit,
        ),
        cost_estimate=pl.CostEstimate(
            flops=flops,
            transcendentals=transcendentals,
            bytes_accessed=bytes_accessed,
        ),
    )(x, w_heads, b_heads, fc_w_heads, fc_b_2d)


def _reference(x, qkv_w, qkv_b, fc_w, fc_b, num_heads):
    """Pure-JAX reference mirroring the PyTorch forward (eval mode)."""
    B, N, E = x.shape
    H = num_heads
    D = E // H
    qkv = (x.reshape(B * N, E) @ qkv_w + qkv_b).reshape(B, N, 3, H, D)
    q, k, v = jnp.transpose(qkv, (2, 0, 3, 1, 4))
    scores = jnp.einsum("bhqd,bhkd->bhqk", q, k) * (1.0 / (D ** 0.5))
    attn = jax.nn.softmax(scores, axis=-1)
    out = jnp.einsum("bhqk,bhkd->bhqd", attn, v)
    out = jnp.transpose(out, (0, 2, 1, 3)).reshape(B, N, E)
    return out @ fc_w + fc_b


if __name__ == "__main__":
    # Small deterministic config consistent with the module.
    B, N, E, H = 2, 8, 32, 4

    key = jax.random.PRNGKey(0)
    kx, kw1, kb1, kw2, kb2 = jax.random.split(key, 5)

    x = jax.random.normal(kx, (B, N, E), dtype=jnp.float32)

    # Deterministic synthetic parameters (shapes from nn.Linear in __init__),
    # stored as (in_features, out_features).
    qkv_w = jax.random.normal(kw1, (E, 3 * E), dtype=jnp.float32) * 0.05
    qkv_b = jax.random.normal(kb1, (3 * E,), dtype=jnp.float32) * 0.01
    fc_w = jax.random.normal(kw2, (E, E), dtype=jnp.float32) * 0.05
    fc_b = jax.random.normal(kb2, (E,), dtype=jnp.float32) * 0.01

    out = multi_head_attention(x, qkv_w, qkv_b, fc_w, fc_b, num_heads=H)
    jax.block_until_ready(out)
    assert out.shape == (B, N, E)

    ref = _reference(x, qkv_w, qkv_b, fc_w, fc_b, H)
    max_err = float(jnp.max(jnp.abs(out - ref)))
    assert jnp.allclose(out, ref, atol=2e-2, rtol=2e-2), max_err

    print("KERNEL_OK")
</pallas_src>

<mosaic_0001>
module attributes {stable_mosaic.version = 11 : i64} {
  func.func @_mha_kernel(%arg0: i32, %arg1: i32, %arg2: memref<1x8x32xf32, #tpu.memory_space<vmem>>, %arg3: memref<1x32x24xf32, #tpu.memory_space<vmem>>, %arg4: memref<1x1x24xf32, #tpu.memory_space<vmem>>, %arg5: memref<1x8x32xf32, #tpu.memory_space<vmem>>, %arg6: memref<1x32xf32, #tpu.memory_space<vmem>>, %arg7: memref<1x8x32xf32, #tpu.memory_space<vmem>>, %arg8: memref<8x32xf32, #tpu.memory_space<vmem>>) attributes {dimension_semantics = [#tpu.dimension_semantics<parallel>, #tpu.dimension_semantics<arbitrary>], iteration_bounds = array<i64: 2, 4>, scalar_prefetch = 0 : i64, scratch_operands = 1 : i64, tpu.core_type = #tpu.core_type<tc>, window_params = [{transform_indices = @transform_0, window_bounds = array<i64: 1, 8, 32>}, {transform_indices = @transform_1, window_bounds = array<i64: 1, 32, 24>}, {transform_indices = @transform_2, window_bounds = array<i64: 1, 1, 24>}, {transform_indices = @transform_3, window_bounds = array<i64: 1, 8, 32>}, {pipeline_mode = #tpu.pipeline_mode<synchronous>, transform_indices = @transform_4, window_bounds = array<i64: 1, 32>}, {transform_indices = @transform_5, window_bounds = array<i64: 1, 8, 32>}]} {
    %c0_i32 = arith.constant 0 : i32
    %0 = arith.cmpi eq, %arg1, %c0_i32 : i32
    %1 = arith.extui %0 : i1 to i32
    %c0_i32_0 = arith.constant 0 : i32
    %2 = arith.cmpi ne, %1, %c0_i32_0 : i32
    scf.if %2 {
      %cst_22 = arith.constant 0.000000e+00 : f32
      %36 = vector.broadcast %cst_22 : f32 to vector<8x32xf32>
      %c0_23 = arith.constant 0 : index
      %c0_24 = arith.constant 0 : index
      %37 = vector.load %arg8[%c0_23, %c0_24] : memref<8x32xf32, #tpu.memory_space<vmem>>, vector<8x32xf32>
      tpu.vector_store %arg8[%c0_23, %c0_24], %36 {strides = array<i32>} : memref<8x32xf32, #tpu.memory_space<vmem>>, vector<8x32xf32>,
    } else {
    }
    %c0 = arith.constant 0 : index
    %c0_1 = arith.constant 0 : index
    %c0_2 = arith.constant 0 : index
    %3 = vector.load %arg2[%c0, %c0_1, %c0_2] : memref<1x8x32xf32, #tpu.memory_space<vmem>>, vector<1x8x32xf32>
    %4 = vector.shape_cast %3 : vector<1x8x32xf32> to vector<8x32xf32>
    %c0_3 = arith.constant 0 : index
    %c0_4 = arith.constant 0 : index
    %c0_5 = arith.constant 0 : index
    %5 = vector.load %arg3[%c0_3, %c0_4, %c0_5] : memref<1x32x24xf32, #tpu.memory_space<vmem>>, vector<1x32x24xf32>
    %6 = vector.shape_cast %5 : vector<1x32x24xf32> to vector<32x24xf32>
    %c0_6 = arith.constant 0 : index
    %c0_7 = arith.constant 0 : index
    %c0_8 = arith.constant 0 : index
    %7 = vector.load %arg4[%c0_6, %c0_7, %c0_8] : memref<1x1x24xf32, #tpu.memory_space<vmem>>, vector<1x1x24xf32>
    %8 = vector.shape_cast %7 : vector<1x1x24xf32> to vector<1x24xf32>
    %cst = arith.constant dense<0.000000e+00> : vector<8x24xf32>
    %9 = tpu.matmul %4, %6, %cst {dimension_numbers = #tpu.dot_dimension_numbers<[1], [0], [0], [1], [0, 0, 1, 1], [], []>} : vector<8x32xf32>, vector<32x24xf32>, vector<8x24xf32> -> vector<8x24xf32>
    %10 = vector.broadcast %8 : vector<1x24xf32> to vector<8x24xf32>
    %11 = arith.addf %9, %10 : vector<8x24xf32>
    %12 = vector.extract_strided_slice %11 {offsets = [0, 0], sizes = [8, 8], strides = [1, 1]} : vector<8x24xf32> to vector<8x8xf32>
    %13 = vector.extract_strided_slice %11 {offsets = [0, 8], sizes = [8, 8], strides = [1, 1]} : vector<8x24xf32> to vector<8x8xf32>
    %14 = vector.extract_strided_slice %11 {offsets = [0, 16], sizes = [8, 8], strides = [1, 1]} : vector<8x24xf32> to vector<8x8xf32>
    %cst_9 = arith.constant dense<0.000000e+00> : vector<8x8xf32>
    %15 = tpu.matmul %12, %13, %cst_9 {dimension_numbers = #tpu.dot_dimension_numbers<[1], [1], [0], [0], [0, 0, 1, 0], [], []>} : vector<8x8xf32>, vector<8x8xf32>, vector<8x8xf32> -> vector<8x8xf32>
    %cst_10 = arith.constant dense<0xFF800000> : vector<8xf32>
    %16 = vector.multi_reduction <maximumf>, %15, %cst_10 [1] : vector<8x8xf32> to vector<8xf32>
    %17 = vector.shape_cast %16 : vector<8xf32> to vector<8x1xf32>
    %18 = vector.broadcast %17 : vector<8x1xf32> to vector<8x8xf32>
    %19 = arith.subf %15, %18 : vector<8x8xf32>
    %20 = math.exp %19 : vector<8x8xf32>
    %cst_11 = arith.constant dense<0.000000e+00> : vector<8xf32>
    %21 = vector.multi_reduction <add>, %20, %cst_11 [1] : vector<8x8xf32> to vector<8xf32>
    %22 = vector.shape_cast %21 : vector<8xf32> to vector<8x1xf32>
    %cst_12 = arith.constant dense<0.000000e+00> : vector<8x8xf32>
    %23 = tpu.matmul %20, %14, %cst_12 {dimension_numbers = #tpu.dot_dimension_numbers<[1], [0], [0], [1], [0, 0, 1, 1], [], []>} : vector<8x8xf32>, vector<8x8xf32>, vector<8x8xf32> -> vector<8x8xf32>
    %24 = tpu.reciprocal %22 {approx = true} : vector<8x1xf32> -> vector<8x1xf32>
    %25 = vector.broadcast %24 : vector<8x1xf32> to vector<8x8xf32>
    %26 = arith.mulf %23, %25 : vector<8x8xf32>
    %c0_13 = arith.constant 0 : index
    %c0_14 = arith.constant 0 : index
    %c0_15 = arith.constant 0 : index
    %27 = vector.load %arg5[%c0_13, %c0_14, %c0_15] : memref<1x8x32xf32, #tpu.memory_space<vmem>>, vector<1x8x32xf32>
    %28 = vector.shape_cast %27 : vector<1x8x32xf32> to vector<8x32xf32>
    %c0_16 = arith.constant 0 : index
    %c0_17 = arith.constant 0 : index
    %29 = vector.load %arg8[%c0_16, %c0_17] : memref<8x32xf32, #tpu.memory_space<vmem>>, vector<8x32xf32>
    %cst_18 = arith.constant dense<0.000000e+00> : vector<8x32xf32>
    %30 = tpu.matmul %26, %28, %cst_18 {dimension_numbers = #tpu.dot_dimension_numbers<[1], [0], [0], [1], [0, 0, 1, 1], [], []>} : vector<8x8xf32>, vector<8x32xf32>, vector<8x32xf32> -> vector<8x32xf32>
    %31 = arith.addf %29, %30 : vector<8x32xf32>
    %c0_19 = arith.constant 0 : index
    %c0_20 = arith.constant 0 : index
    %32 = vector.load %arg8[%c0_19, %c0_20] : memref<8x32xf32, #tpu.memory_space<vmem>>, vector<8x32xf32>
    tpu.vector_store %arg8[%c0_19, %c0_20], %31 {strides = array<i32>} : memref<8x32xf32, #tpu.memory_space<vmem>>, vector<8x32xf32>,
    %c3_i32 = arith.constant 3 : i32
    %33 = arith.cmpi eq, %arg1, %c3_i32 : i32
    %34 = arith.extui %33 : i1 to i32
    %c0_i32_21 = arith.constant 0 : i32
    %35 = arith.cmpi ne, %34, %c0_i32_21 : i32
    scf.if %35 {
      %c0_22 = arith.constant 0 : index
      %c0_23 = arith.constant 0 : index
      %36 = vector.load %arg8[%c0_22, %c0_23] : memref<8x32xf32, #tpu.memory_space<vmem>>, vector<8x32xf32>
      %c0_24 = arith.constant 0 : index
      %c0_25 = arith.constant 0 : index
      %37 = vector.load %arg6[%c0_24, %c0_25] : memref<1x32xf32, #tpu.memory_space<vmem>>, vector<1x32xf32>
      %38 = vector.broadcast %37 : vector<1x32xf32> to vector<8x32xf32>
      %39 = arith.addf %36, %38 : vector<8x32xf32>
      %c0_26 = arith.constant 0 : index
      %c0_27 = arith.constant 0 : index
      %c0_28 = arith.constant 0 : index
      %40 = vector.load %arg7[%c0_26, %c0_27, %c0_28] : memref<1x8x32xf32, #tpu.memory_space<vmem>>, vector<1x8x32xf32>
      %41 = vector.shape_cast %40 : vector<1x8x32xf32> to vector<8x32xf32>
      %42 = vector.shape_cast %39 : vector<8x32xf32> to vector<1x8x32xf32>
      tpu.vector_store %arg7[%c0_26, %c0_27, %c0_28], %42 {strides = array<i32>} : memref<1x8x32xf32, #tpu.memory_space<vmem>>, vector<1x8x32xf32>,
    } else {
    }
    return
  }
  func.func @transform_0(%arg0: i32, %arg1: i32) -> (i32, i32, i32) {
    %c0_i32 = arith.constant 0 : i32
    %c0_i32_0 = arith.constant 0 : i32
    %c0_i32_1 = arith.constant 0 : i32
    return %arg0, %c0_i32, %c0_i32_0 : i32, i32, i32
  }
  func.func @transform_1(%arg0: i32, %arg1: i32) -> (i32, i32, i32) {
    %c0_i32 = arith.constant 0 : i32
    %c0_i32_0 = arith.constant 0 : i32
    %c0_i32_1 = arith.constant 0 : i32
    return %arg1, %c0_i32, %c0_i32_0 : i32, i32, i32
  }
  func.func @transform_2(%arg0: i32, %arg1: i32) -> (i32, i32, i32) {
    %c0_i32 = arith.constant 0 : i32
    %c0_i32_0 = arith.constant 0 : i32
    %c0_i32_1 = arith.constant 0 : i32
    return %arg1, %c0_i32, %c0_i32_0 : i32, i32, i32
  }
  func.func @transform_3(%arg0: i32, %arg1: i32) -> (i32, i32, i32) {
    %c0_i32 = arith.constant 0 : i32
    %c0_i32_0 = arith.constant 0 : i32
    %c0_i32_1 = arith.constant 0 : i32
    return %arg1, %c0_i32, %c0_i32_0 : i32, i32, i32
  }
  func.func @transform_4(%arg0: i32, %arg1: i32) -> (i32, i32) {
    %c0_i32 = arith.constant 0 : i32
    %c0_i32_0 = arith.constant 0 : i32
    %c0_i32_1 = arith.constant 0 : i32
    return %c0_i32, %c0_i32_0 : i32, i32
  }
  func.func @transform_5(%arg0: i32, %arg1: i32) -> (i32, i32, i32) {
    %c0_i32 = arith.constant 0 : i32
    %c0_i32_0 = arith.constant 0 : i32
    %c0_i32_1 = arith.constant 0 : i32
    return %arg0, %c0_i32, %c0_i32_0 : i32, i32, i32
  }
}

</mosaic_0001>

<bundles_post_ra>
// kernel: tpu_custom_call.1
= control target key start
LH: loop header
LB: loop body
LE: loop exit
PB: predicated region body
PF: predicated region fallthrough
CT: control target
= control target key end

     0   :  { %10 = vsyncpa [#allocation4], 0  ;;  %s931_s0 = inlined_call_operand.vmem [shape: f32[2,8,32], index: 0, kind: input, shape index: {}]   ;;  %s932_s1 = inlined_call_operand.vmem [shape: f32[4,32,24], index: 1, kind: input, shape index: {}]   ;;  %s933_s2 = inlined_call_operand.vmem [shape: f32[4,1,24], index: 2, kind: input, shape index: {}]   ;;  %s934_s3 = inlined_call_operand.vmem [shape: f32[4,8,32], index: 3, kind: input, shape index: {}]   ;;  %s935_s4 = inlined_call_operand.vmem [shape: f32[1,32], index: 4, kind: input, shape index: {}]   ;;  %s936_s5 = inlined_call_operand.hbm [shape: f32[2,8,32], index: 5, kind: output, shape index: {}]  }
   0x1   :  { %12 = vsyncpa [#allocation4 + $0x1], 0  ;;  %s775_s18 = smov 0   ;;  %s777_s19 = smov 0  }
   0x2   :  { %s779_s20 = smov 0   ;;  %s781_s21 = smov 0  }
   0x3   :  { %s783_s22 = smov 0   ;;  %s785_s23 = smov 0  }
   0x4   :  { %s787_s24 = smov 0   ;;  %s789_s25 = smov 0  }
   0x5 LB: > { %942 = sst [smem:[#allocation6_spill]] %s720_s20  ;;  %s544_s26 = sadd.s32 4294967295, %s740_s25   ;;  %s740_s25 = sphi %s789_s25, %s18_s25   ;;  %s736_s24 = sphi %s787_s24, %s956_s24   ;;  %s732_s23 = sphi %s785_s23, %s955_s23   ;;  %s728_s22 = sphi %s783_s22, %s954_s22   ;;  %s724_s21 = sphi %s781_s21, %s953_s21   ;;  %s720_s20 = sphi %s779_s20, %s952_s20   ;;  %s716_s19 = sphi %s777_s19, %s958_s19   ;;  %s712_s18 = sphi %s775_s18, %s957_s18  }
   0x6   : > { %943 = sst [smem:[#allocation7_spill]] %s732_s23  ;;  %s545_s27 = sadd.s32 4294967294, %s740_s25  }
   0x7   : > { %944 = sst [smem:[#allocation8_spill]] %s736_s24  ;;  %s27_s28 = sadd.s32 1, %s732_s23 }
   0x8   : > { %p28_p0 = scmp.ge.s32.totalorder %s27_s28, 4  ;;  %s30_s29 = sadd.s32 1, %s736_s24 }
   0x9   : > { %p172_p1 = scmp.ne.s32.totalorder %s720_s20, %s716_s19  ;;  %p173_p2 = scmp.eq.s32.totalorder %s544_s26, 7 }
   0xa   : > { %s960_s28 = smov (%p28_p0, %s27_s28), 0  ;;  %s962_s29 = smov (!%p28_p0, %s30_s29), %s736_s24 }
   0xb   : > { %945 = sst [smem:[#allocation9_spill]] %s960_s28  ;;  %p824_p3 = por %p173_p2, %p172_p1 }
   0xc   : > { %p178_p4 = scmp.ne.s32.totalorder %s716_s19, %s712_s18  ;;  %p32_p5 = scmp.ge.s32.totalorder %s962_s29, 2 }
   0xd   : > { %p179_p6 = scmp.eq.s32.totalorder %s545_s27, 7  ;;  %p548_p7 = scmp.ge.s32.totalorder %s740_s25, 1 }
   0xe   : > { %p228_p8 = scmp.lt.s32.totalorder %s740_s25, 9  ;;  %s964_s29 = smov (%p32_p5, %s962_s29), 0 }
   0xf   : > { %947 = sst [smem:[#allocation10_spill]] %s964_s29  ;;  %p834_p9 = por %p179_p6, %p178_p4 }
  0x10   : > { %p229_p10 = pnand %p548_p7, %p228_p8  ;;  %s159_s7 = ssub.s32 %s736_s24, %s964_s29 }
  0x11   : > { %s162_s8 = sadd.s32 1, %s720_s20  ;;  %p160_p11 = scmp.eq.s32.totalorder %s159_s7, 0 }
  0x12   : > { %232 = sbr.rel (%p229_p10) target bundleno = 837 (0x345), region = 40  ;;  %s939_s10 = sand.u32 (!%p229_p10), 1, %s716_s19  }
  0x13   : > { %s842_s9 = scalar_select %p160_p11, %s720_s20, %s162_s8  }
  0x14   : > { %p267_p12 = scmp.lt.s32.totalorder (!%p229_p10), %s728_s22, 1  ;;  %s848_s11 = sshll.u32 (!%p229_p10), %s939_s10, 3 }
  0x15   : > { %949 = sst [smem:[#allocation11_spill]] %s842_s9  ;;  %p271_p13 = scmp.lt.s32.totalorder (!%p229_p10), %s724_s21, 3 }
  0x16   : > { %p554_p0 = scmp.ne.s32.totalorder (!%p229_p10), %s724_s21, 0 }
  0x17   : > { %s268_s12 = scalar_select %p267_p12, %s728_s22, 1 }
  0x18   : > { %s272_s13 = scalar_select %p271_p13, %s724_s21, 3 }
  0x19   : > { %s550_s14 = sshll.u32 %s268_s12, 3  ;;  %s266_s12 = scalar_lea.vmem [#allocation3], %s848_s11 }
  0x1a   : > { %s270_s17 = scalar_lea.vmem %s931_s0, %s550_s14  ;;  %s565_s26 = sshll.u32 %s272_s13, 5 }
  0x1b   : > { %s275_s8 = scalar_lea.vmem %s932_s1, %s565_s26  ;;  %s278_s24 = scalar_lea.vmem %s933_s2, %s272_s13 }
  0x1c   : > { %s553_s10 = sshll.u32 %s272_s13, 3  ;;  %286 = sbr.rel (%p554_p0) target bundleno = 35 (0x23), region = 44 }
  0x1d   : > { %s865_s20 = scalar_lea.vmem %s934_s3, %s553_s10 }
  0x21   : > { %vm287_vm0 = vcmask 261120   ;;  %v742_v0 = vmov 0.0  }
  0x22   : > { %288 = vst.msk [vmem:[#allocation2] sm:$0xff] %vm287_vm0, %v742_v0 }
  0x23 PF: > { %v293_v1 = vld [vmem:[%s275_s8 + $0x18] sm:$0xff]  ;;  %v292_v2 = vld [vmem:[%s275_s8 + $0x10] sm:$0xff]  ;;  %v291_v3 = vld [vmem:[%s275_s8 + $0x8] sm:$0xff]  ;;  %vm298_vm1 = vcmask 261120   ;;  %s743_s23 = smov 112   ;;  %s744_s28 = smov 120  }
  0x24   : > { %314 = vmatpush.msra.mxu0 %v293_v1  ;;  %v290_v4 = vld [vmem:[%s275_s8] sm:$0xff]  ;;  %vm325_vm2 = vcmask 64512   ;;  %p560_p1 = scmp.ne.s32.totalorder %s724_s21, 3 }
  0x25   : > { %v289_v5 = vld [vmem:[%s270_s17] sm:$0xff] }
  0x26   : > { %315 = vmatpush.msra.mxu0 %v292_v2  ;;  %v640_v6 = vld [vmem:[%s278_s24] ss:$0 sm:$0xff] }
  0x27   : > { %v387_v18 = vld [vmem:[%s865_s20] sm:$0xff] }
  0x28   : > { %316 = vmatpush.msra.mxu0 %v291_v3  ;;  %407 = vmatpush.msra.mxu3 %v387_v18 }
  0x29   : > { %v388_v23 = vld [vmem:[#allocation2] sm:$0xff] }
  0x2a   : > { %317 = vmatpush.msra.mxu0 %v290_v4 }
  0x2b   : > { %555 = vmatmul.msk.f32.vlgmr.msra.gmra.mxu0 %vm298_vm1, %v289_v5 }
  0xa8   : > { %v319_v7 = vpop.f32.mrf.mxu0 }
  0xa9   : > { %v320_v8 = vadd.f32 %v640_v6, %v319_v7 }
  0xab   : > { %359 = vrot.lane.b32.xlu1 %v320_v8, %s743_s23  ;;  %323 = vrot.lane.b32.xlu0 %v320_v8, %s744_s28 }
 0x11d   : > { %v360_v9 = vpop.permute.xlu1 %359  ;;  %v324_v10 = vpop.permute.xlu0 %323 }
 0x11e   : > { %556 = vmatpush.xpose.msk.msra.mxu1 %vm325_vm2, %v324_v10  ;;  %380 = vmatpush.msra.mxu2 %v360_v9 }
 0x121   : > { %557 = vmatmul.msk.f32.vlgmr.msra.gmra.mxu1 %vm325_vm2, %v320_v8 }
 0x19e   : > { %v347_v11 = vpop.f32.mrf.mxu1 }
 0x19f   : > { %v350_v12 = vsel %vm325_vm2, %v347_v11, -inf }
 0x1a0   : > { %351 = vmax.xlane.f32.xlu0 %v350_v12 }
 0x213   : > { %v352_v13 = vpop.xlane.xlu0 %351 }
 0x214   : > { %v353_v14 = vsub.f32 %v347_v11, %v352_v13 }
 0x216   : > { %v354_v15 = vmul.f32 1.442695, %v353_v14 }
 0x218   : > { %641 = vpow2.f32 %v354_v15 }
 0x21e   : > { %v642_v16 = vpop.eup %641 }
 0x21f   : > { %558 = vmatmul.msk.f32.vlgmr.msra.gmra.mxu2 %vm325_vm2, %v642_v16  ;;  %v356_v17 = vsel %vm325_vm2, %v642_v16, 0.0 }
 0x220   : > { %357 = vadd.xlane.f32.xlu1 %v356_v17 }
 0x293   : > { %v358_v19 = vpop.xlane.xlu1 %357 }
 0x294   : > { %643 = vrcp.f32 %v358_v19 }
 0x29a   : > { %v644_v20 = vpop.eup %643 }
 0x2a2   : > { %v382_v21 = vpop.f32.mrf.mxu2 }
 0x2a3   : > { %v386_v22 = vmul.f32 %v644_v20, %v382_v21 }
 0x2a5   : > { %559 = vmatmul.msk.f32.vlgmr.msra.gmra.mxu3 %vm325_vm2, %v386_v22 }
 0x327   : > { %417 = sbr.rel (%p560_p1) target bundleno = 822 (0x336), region = 48 }
 0x328   : > { %v409_v24 = vpop.f32.mrf.mxu3 }
 0x329   : > { %v412_v25 = vadd.f32 %v409_v24, %v388_v23 }
 0x32b   : > { %413 = vst.msk [vmem:[#allocation2] sm:$0xff] %vm298_vm1, %v412_v25 }
 0x32c   : > { %v645_v27 = vld [vmem:[%s935_s4] ss:$0 sm:$0xff] }
 0x332   : > { %v418_v26 = vld [vmem:[#allocation2] sm:$0xff] }
 0x333   : > { %v423_v28 = vadd.f32 %v645_v27, %v418_v26 }
 0x335   : > { %424 = vst.msk [vmem:[%s266_s12] sm:$0xff] %vm298_vm1, %v423_v28 }
 0x336 PF: > { %s562_s20 = sshll.u32 %s728_s22, 3  ;;  %s438_s13 = sshll.u32 %s266_s12, 4  ;;  %s439_s13 = int_to_ptr.vmem [resolvable:$true] %s438_s13 }
 0x337   : > { %s436_s21 = scalar_lea.hbm %s936_s5, %s562_s20  ;;  %s950_s15 = sand.u32 1, %s716_s19  }
 0x338   : > { %s440_s14 = sshll.u32 %s436_s21, 4  ;;  %s426_s16 = scalar_lea.sflag [#allocation4], %s950_s15  ;;  %s441_s14 = int_to_ptr.hbm [resolvable:$true] %s440_s14 }
 0x339   : > { %s660_s17 = sshra.s32 %s441_s14, 4  ;;  %s666_s7 = scalar_lea.hbm %s936_s5, 16  ;;  %s661_s17 = int_to_ptr.hbm [resolvable:$true] %s660_s17 }
 0x33a   : > { %s662_s26 = scalar_lea.hbm %s661_s17, 8  ;;  %p667_p6 = scmp.lt.s32.totalorder %s661_s17, %s936_s5 }
 0x33b   : > { %p663_p2 = scmp.ne.s32.totalorder %s661_s17, %s662_s26  ;;  %p668_p7 = scmp.lt.s32.totalorder %s666_s7, %s662_s26 }
 0x33d   : > { %p664_p4 = pnand %p663_p2, %p824_p3  ;;  %p669_p8 = por %p668_p7, %p667_p6 }
 0x33f   : > { %p665_p5 = pneg %p664_p4 }
 0x341   : > { %p670_p10 = pnand %p669_p8, %p665_p5 }
 0x343   : > { %673 = shalt.err (!%p670_p10)
}
 0x344   : > { %566 = dma.vmem_to_hbm [thread:$0]  (%p824_p3), %s439_s13, 128, %s441_s14, %s426_s16  }
 0x345 PF: > { %p572_p11 = scmp.ge.s32.totalorder %s740_s25, 2  ;;  %s452_s11 = sand.u32 1, %s712_s18  }
 0x346   : > { %s453_s12 = scalar_lea.sflag [#allocation4], %s452_s11 }
 0x347   : > { %p569_p12 = pnand %p572_p11, %p834_p9 }
 0x349   : > { %p570_p13 = pneg %p569_p12 }
 0x34b   : > { %707 = dma.done.wait (%p570_p13), %s453_s12, 128  }
 0x34c   : > { %709 = vsyncadd (%p570_p13), %s453_s12, 4294967168  ;;  %s18_s25 = sadd.s32 1, %s740_s25   ;;  %s951_s28 = sld [smem:[#allocation6_spill]] }
 0x34d   : > { %p15_p0 = scmp.ge.s32.totalorder %s18_s25, 10   ;;  %s952_s20 = sld [smem:[#allocation11_spill]] }
 0x34e   : > { %s953_s21 = sld [smem:[#allocation7_spill]]  ;;  %s957_s18 = smov %s716_s19 }
 0x34f   : > { %s954_s22 = sld [smem:[#allocation8_spill]]  ;;  %17 = sbr.rel (!%p15_p0) target bundleno = 5 (0x5), region = 92 }
 0x350   : > { %s955_s23 = sld [smem:[#allocation9_spill]] }
 0x351   : > { %s956_s24 = sld [smem:[#allocation10_spill]] }
 0x352   : > { %s958_s19 = smov %s951_s28 }
 0x354   :  { %459 = vsyncpa [#allocation4], 1 }
 0x355   :  { %461 = vsyncpa [#allocation4 + $0x1], 1 }

</bundles_post_ra>
